<compile_context>
chip_gen: v7x
topology: tpu7x:2x2x1
jax: 0.10.0
libtpu: 0.0.40
codegen_flags: <defaults>
</compile_context>

<pallas_src>
import functools

import numpy as np
import jax
import jax.numpy as jnp
from jax.experimental import pallas as pl
from jax.experimental.pallas import tpu as pltpu


LANE = 128


def _round_up(x, m):
    return ((x + m - 1) // m) * m


# ----------------------------- fused Pallas kernel ---------------------------

def _fused_parser_kernel(
    feats_ref,        # (S, H)       f32  token features
    mention_idx_ref,  # (MP, 8)      i32  cols: [start, end, type, 0...]
    pair_cols_ref,    # (PP, 8)      i32  cols: absolute slab column per feature
    param32_ref,      # (2H+16+KTOT, F) f32  [W1_c_hid | W1_p_hid | typeC | typeP | tables]
    param128_ref,     # (F+8, 128)   f32  [W2_pad ; b2_pad ; zeros]
    out_ref,          # (PP, 128)    f32  lane-dense scores
    slab_ref,         # (KTOT, F)    f32  scratch: gather slab
):
    f32 = jnp.float32
    S, H = feats_ref.shape
    MP = mention_idx_ref.shape[0]
    PP = out_ref.shape[0]
    KTOT, F = slab_ref.shape

    dot = functools.partial(jnp.dot, preferred_element_type=f32)

    # static row offsets inside the packed 32-lane parameter slab
    o_w1c = 0
    o_w1p = H
    o_tc = 2 * H
    o_tp = 2 * H + 8
    o_tab = 2 * H + 16

    # ---- 1. mention span-mean pooling (merge_tokens, type='mean') ----------
    mi = mention_idx_ref[...]
    starts = mi[:, 0:1]
    ends = mi[:, 1:2]
    mtype = mi[:, 2:3]
    pos = jax.lax.broadcasted_iota(jnp.int32, (MP, S), 1)
    span_mask = jnp.logical_and(pos >= starts, pos < ends).astype(f32)
    span_len = jnp.maximum(jnp.sum(span_mask, axis=1, keepdims=True), 1.0)
    inv_len = pl.reciprocal(span_len, approx=False)
    mention_hid = dot(span_mask * inv_len, feats_ref[...])          # (MP, H)

    # ---- 2. feats-dependent node projections (child / parent W1 blocks) ----
    t_oh = (jax.lax.broadcasted_iota(jnp.int32, (MP, 8), 1) == mtype).astype(f32)
    node_c = (dot(mention_hid, param32_ref[o_w1c:o_w1c + H, :])
              + dot(t_oh, param32_ref[o_tc:o_tc + 8, :]))           # (MP, F)
    node_p = (dot(mention_hid, param32_ref[o_w1p:o_w1p + H, :])
              + dot(t_oh, param32_ref[o_tp:o_tp + 8, :]))           # (MP, F)

    # ---- 3. gather slab = precomputed tables + in-kernel node rows ---------
    slab_ref[...] = param32_ref[o_tab:o_tab + KTOT, :]
    slab_ref[0:MP, :] = node_c                                      # child node rows
    slab_ref[MP + 8:2 * MP + 8, :] = node_p                         # parent node rows

    # ---- 4. all pair gathers + MLP dense fused into one matmul -------------
    pc = pair_cols_ref[...]
    iot = jax.lax.broadcasted_iota(jnp.int32, (PP, KTOT), 1)
    hit = iot == pc[:, 0:1]
    hit = jnp.logical_or(hit, iot == pc[:, 1:2])
    hit = jnp.logical_or(hit, iot == pc[:, 2:3])
    hit = jnp.logical_or(hit, iot == pc[:, 3:4])
    hit = jnp.logical_or(hit, iot == pc[:, 4:5])
    hidden = jnp.maximum(dot(hit.astype(f32), slab_ref[...]), 0.0)  # b1 folded in dist rows
    # TODO(synk): MLP dropout omitted (p=0.0 / inference semantics).

    # ---- 5. output Linear -> lane-dense (PP, 128) store ---------------------
    p128 = param128_ref[...]
    out_ref[...] = dot(hidden, p128[0:F, :]) + p128[F:F + 1, :]


# ---------------------------- Parameter container ----------------------------

class ModalDependencyGraphParserPallas:
    def __init__(self, key, hidden_size=32, type_dim=8, dist_dim=8,
                 num_candidate_parent=4, label_size=5):
        assert label_size <= LANE
        self.hidden_size = hidden_size
        self.type_dim = type_dim
        self.dist_dim = dist_dim
        self.num_candidate_parent = num_candidate_parent
        self.label_size = label_size
        self.node_dim = hidden_size + type_dim
        self.pair_dim = 2 * self.node_dim + 3 * dist_dim
        self.ffn_hidden_dim = hidden_size

        ks = jax.random.split(key, 12)
        rnd = jax.random.normal
        f32 = jnp.float32
        H, F, ND, DD = hidden_size, hidden_size, self.node_dim, dist_dim

        # embeddings (EmbedLayer): type(3), sent(25), dist(50)
        self.type_embed_w = rnd(ks[0], (3, type_dim), f32)
        self.sent_embed_w = rnd(ks[1], (25, dist_dim), f32)
        self.dist_embed_w = rnd(ks[2], (50, dist_dim), f32)
        # MLP(pair_dim -> ffn_hidden) + Linear(ffn_hidden -> label_size)
        self.w1 = rnd(ks[3], (self.pair_dim, hidden_size), f32) * 0.1
        self.b1 = rnd(ks[4], (1, hidden_size), f32) * 0.1
        self.w2 = rnd(ks[5], (hidden_size, label_size), f32) * 0.1
        self.b2 = rnd(ks[6], (1, label_size), f32) * 0.1
        # special node vectors
        self.author_vec = rnd(ks[7], (self.node_dim,), f32)
        self.null_vec = rnd(ks[8], (self.node_dim,), f32)
        self.root_vec = rnd(ks[9], (self.node_dim,), f32)
        self.pad_vec = rnd(ks[10], (self.node_dim,), f32)
        self.dct_vec = rnd(ks[11], (self.node_dim,), f32)  # only used if 'before' label

        # -------- parameter-only projections precomputed ONCE at init --------
        # W1 row layout: [c_node(ND) | c_sent(DD) | p_node(ND) | p_sent(DD) | dist(DD)]
        w1 = self.w1
        self.w1_c_hid = w1[0:H]                                    # (H, F)
        self.w1_p_hid = w1[ND + DD:ND + DD + H]
        type_w_pad = jnp.zeros((8, type_dim), f32).at[:3].set(self.type_embed_w)
        meta_pad = (jnp.zeros((8, ND), f32)
                    .at[0].set(self.pad_vec).at[1].set(self.null_vec)
                    .at[2].set(self.author_vec).at[3].set(self.root_vec))
        self.type_c_proj = type_w_pad @ w1[H:ND]                   # (8, F)
        self.type_p_proj = type_w_pad @ w1[ND + DD + H:2 * ND + DD]
        self.meta_c_proj = meta_pad @ w1[0:ND]                     # (8, F)
        self.meta_p_proj = meta_pad @ w1[ND + DD:2 * ND + DD]
        self.sent_c_proj = jnp.zeros((32, F), f32).at[:25].set(
            self.sent_embed_w @ w1[ND:ND + DD])                    # (32, F)
        self.sent_p_proj = jnp.zeros((32, F), f32).at[:25].set(
            self.sent_embed_w @ w1[2 * ND + DD:2 * ND + 2 * DD])
        self.dist_proj = jnp.zeros((56, F), f32).at[:50].set(      # b1 folded here
            self.dist_embed_w @ w1[2 * ND + 2 * DD:2 * ND + 3 * DD] + self.b1)
        # lane-dense output params: [W2 ; b2 ; zeros] padded to 128 lanes
        self.param128 = (jnp.zeros((F + 8, LANE), f32)
                         .at[:F, :label_size].set(self.w2)
                         .at[F, :label_size].set(self.b2[0]))

    # ------------------------------- forward --------------------------------
    def forward(self, feats, mention_spans, sent_lens, node_types,
                child_ids, parent_ids, child_sent_ids, parent_sent_ids,
                pair_distance, gold_one_hot=None, is_training=False):
        """
        feats: (seq_len, hidden) f32;  mention_spans: (M, 2) int [start, end)
        sent_lens: unused here (sentence nodes only feed rgcn/sent_vec paths,
            both disabled in this config).
        node_types: (M + num_sents,) int in [0, 3)
        child_ids: (C,) int; parent_ids/child_sent_ids/parent_sent_ids/
        pair_distance: (C, P) int indices.
        """
        del sent_lens  # dead in this config (use_rgcn=False, sent_vec='none')
        M = mention_spans.shape[0]
        C, P = parent_ids.shape
        pairs = C * P
        MP = _round_up(max(M, 8), 8)
        PP = _round_up(max(pairs, 8), 8)
        F = self.ffn_hidden_dim
        KTOT = 2 * MP + 136
        i32, f32 = jnp.int32, jnp.float32

        # packed mention indices (MP, 8): [start, end, type, 0...]
        mcols = jnp.stack([mention_spans[:, 0].astype(i32),
                           mention_spans[:, 1].astype(i32),
                           node_types[:M].astype(i32)], axis=1)
        mention_idx = jnp.zeros((MP, 8), i32).at[:M, :3].set(mcols)

        # absolute slab column ids per pair feature (slab layout: see tables below)
        off_c_meta = MP
        off_p_node = MP + 8
        off_p_meta = 2 * MP + 8
        off_c_sent = 2 * MP + 16
        off_p_sent = 2 * MP + 48
        off_dist = 2 * MP + 80

        cid = jnp.broadcast_to(child_ids.astype(i32)[:, None], (C, P)).reshape(pairs)
        pid = parent_ids.astype(i32).reshape(pairs)
        cs = child_sent_ids.astype(i32).reshape(pairs)
        ps = parent_sent_ids.astype(i32).reshape(pairs)
        dd = pair_distance.astype(i32).reshape(pairs)
        col_c = jnp.where(cid < M, cid, off_c_meta + (cid - M))
        col_p = jnp.where(pid < M, off_p_node + pid, off_p_meta + (pid - M))
        cols = jnp.stack([col_c, col_p, off_c_sent + cs,
                          off_p_sent + ps, off_dist + dd], axis=1)
        pair_cols = jnp.full((PP, 8), -1, i32).at[:pairs, :5].set(cols)

        # packed f32 parameter slab (constants under jit -> folded at compile)
        tables = jnp.concatenate([
            jnp.zeros((MP, F), f32),   # child node rows, filled in-kernel
            self.meta_c_proj,          # 8
            jnp.zeros((MP, F), f32),   # parent node rows, filled in-kernel
            self.meta_p_proj,          # 8
            self.sent_c_proj,          # 32 (25 valid)
            self.sent_p_proj,          # 32 (25 valid)
            self.dist_proj,            # 56 (50 valid, b1 folded)
        ], axis=0)                     # (KTOT, F)
        param32 = jnp.concatenate([self.w1_c_hid, self.w1_p_hid,
                                   self.type_c_proj, self.type_p_proj,
                                   tables], axis=0)

        vmem = pl.BlockSpec(memory_space=pltpu.MemorySpace.VMEM)
        out = pl.pallas_call(
            _fused_parser_kernel,
            out_shape=jax.ShapeDtypeStruct((PP, LANE), f32),
            in_specs=[vmem] * 5,
            out_specs=vmem,
            scratch_shapes=[pltpu.VMEM((KTOT, F), f32)],
        )(feats, mention_idx, pair_cols, param32, self.param128)

        scores = out[:pairs, :self.label_size].reshape(C, P * self.label_size)
        if not is_training:
            return scores
        gold_rel = jnp.argmax(gold_one_hot.reshape(C, -1), axis=1)
        logp = jax.nn.log_softmax(scores, axis=-1)
        return -jnp.mean(jnp.take_along_axis(logp, gold_rel[:, None], axis=1))

    # ---------------- pure-JAX reference (original concat-based path) -------
    def reference(self, feats, mention_spans, sent_lens, node_types,
                  child_ids, parent_ids, child_sent_ids, parent_sent_ids,
                  pair_distance, gold_one_hot=None, is_training=False):
        del sent_lens
        M = mention_spans.shape[0]
        C, P = parent_ids.shape
        S = feats.shape[0]
        pos = jnp.arange(S)[None, :]
        mask = ((pos >= mention_spans[:, 0:1]) &
                (pos < mention_spans[:, 1:2])).astype(jnp.float32)
        mention_nodes = (mask @ feats) / jnp.maximum(mask.sum(1, keepdims=True), 1.0)
        mention_nodes = jnp.concatenate(
            [mention_nodes, self.type_embed_w[node_types[:M]]], axis=1)
        nodes_pad_meta = jnp.concatenate(
            [mention_nodes, self.pad_vec[None], self.null_vec[None],
             self.author_vec[None], self.root_vec[None]], axis=0)
        child_vecs = nodes_pad_meta[jnp.broadcast_to(child_ids[:, None], (C, P))]
        parent_vecs = nodes_pad_meta[parent_ids]
        child_vecs = jnp.concatenate([child_vecs, self.sent_embed_w[child_sent_ids]], -1)
        parent_vecs = jnp.concatenate([parent_vecs, self.sent_embed_w[parent_sent_ids]], -1)
        cp = jnp.concatenate([child_vecs, parent_vecs,
                              self.dist_embed_w[pair_distance]], -1)
        flat = cp.reshape(C * P, self.pair_dim)
        h = jnp.maximum(flat @ self.w1 + self.b1, 0.0)
        scores = (h @ self.w2 + self.b2).reshape(C, P * self.label_size)
        if not is_training:
            return scores
        gold_rel = jnp.argmax(gold_one_hot.reshape(C, -1), axis=1)
        logp = jax.nn.log_softmax(scores, axis=-1)
        return -jnp.mean(jnp.take_along_axis(logp, gold_rel[:, None], axis=1))


# ----------------------------------- main ------------------------------------

if __name__ == "__main__":
    key = jax.random.PRNGKey(0)
    k_model, k_feat = jax.random.split(key)

    hidden = 32
    seq_len = 64
    num_sents = 4
    num_mentions = 6
    num_child = 3
    P = 4
    label_size = 5

    model = ModalDependencyGraphParserPallas(
        k_model, hidden_size=hidden, type_dim=8, dist_dim=8,
        num_candidate_parent=P, label_size=label_size)

    feats = jax.random.normal(k_feat, (seq_len, hidden), jnp.float32)

    mention_spans = jnp.array(
        [[0, 3], [5, 8], [16, 20], [22, 24], [33, 40], [50, 55]], jnp.int32)
    sent_lens = jnp.array([16, 16, 16, 16], jnp.int32)
    node_types = jnp.array([0, 1, 0, 2, 1, 0, 2, 2, 2, 2], jnp.int32)

    # indices into nodes_pad_meta of size num_mentions + 4 = 10
    child_ids = jnp.array([0, 2, 4], jnp.int32)
    parent_ids = jnp.array([[1, 3, 8, 9],
                            [0, 5, 7, 9],
                            [2, 3, 6, 8]], jnp.int32)
    child_sent_ids = jnp.array([[0] * P, [1] * P, [2] * P], jnp.int32)
    parent_sent_ids = jnp.array([[0, 1, 21, 24],
                                 [0, 3, 23, 24],
                                 [1, 1, 22, 24]], jnp.int32)
    pair_distance = jnp.array([[0, 49, 29, 26],
                               [1, 48, 28, 27],
                               [2, 1, 30, 28]], jnp.int32)

    fwd = jax.jit(lambda *a: model.forward(*a, is_training=False))
    out = fwd(feats, mention_spans, sent_lens, node_types,
              child_ids, parent_ids, child_sent_ids, parent_sent_ids,
              pair_distance)
    out = jax.block_until_ready(out)

    ref = model.reference(feats, mention_spans, sent_lens, node_types,
                          child_ids, parent_ids, child_sent_ids,
                          parent_sent_ids, pair_distance, is_training=False)
    np.testing.assert_allclose(np.asarray(out), np.asarray(ref),
                               rtol=1e-4, atol=1e-4)
    assert out.shape == (num_child, P * label_size)
    print("KERNEL_OK")
</pallas_src>

<mosaic_0001>
module attributes {stable_mosaic.version = 11 : i64} {
  func.func @_fused_parser_kernel(%arg0: memref<64x32xf32, #tpu.memory_space<vmem>>, %arg1: memref<8x8xi32, #tpu.memory_space<vmem>>, %arg2: memref<16x8xi32, #tpu.memory_space<vmem>>, %arg3: memref<232x32xf32, #tpu.memory_space<vmem>>, %arg4: memref<40x128xf32, #tpu.memory_space<vmem>>, %arg5: memref<16x128xf32, #tpu.memory_space<vmem>>, %arg6: memref<152x32xf32, #tpu.memory_space<vmem>>) attributes {dimension_semantics = [], scalar_prefetch = 0 : i64, scratch_operands = 1 : i64, tpu.core_type = #tpu.core_type<tc>} {
    %c0 = arith.constant 0 : index
    %c0_0 = arith.constant 0 : index
    %0 = vector.load %arg1[%c0, %c0_0] : memref<8x8xi32, #tpu.memory_space<vmem>>, vector<8x8xi32>
    %1 = vector.extract_strided_slice %0 {offsets = [0, 0], sizes = [8, 1], strides = [1, 1]} : vector<8x8xi32> to vector<8x1xi32>
    %2 = vector.extract_strided_slice %0 {offsets = [0, 1], sizes = [8, 1], strides = [1, 1]} : vector<8x8xi32> to vector<8x1xi32>
    %3 = vector.extract_strided_slice %0 {offsets = [0, 2], sizes = [8, 1], strides = [1, 1]} : vector<8x8xi32> to vector<8x1xi32>
    %4 = tpu.iota {dimensions = array<i32: 1>} : vector<8x64xi32>
    %5 = vector.broadcast %1 : vector<8x1xi32> to vector<8x64xi32>
    %6 = arith.cmpi sge, %4, %5 : vector<8x64xi32>
    %7 = vector.broadcast %2 : vector<8x1xi32> to vector<8x64xi32>
    %8 = arith.cmpi slt, %4, %7 : vector<8x64xi32>
    %9 = arith.andi %6, %8 : vector<8x64xi1>
    %10 = arith.extui %9 : vector<8x64xi1> to vector<8x64xi32>
    %11 = arith.sitofp %10 : vector<8x64xi32> to vector<8x64xf32>
    %cst = arith.constant dense<0.000000e+00> : vector<8xf32>
    %12 = vector.multi_reduction <add>, %11, %cst [1] : vector<8x64xf32> to vector<8xf32>
    %13 = vector.shape_cast %12 : vector<8xf32> to vector<8x1xf32>
    %cst_1 = arith.constant 1.000000e+00 : f32
    %14 = vector.broadcast %cst_1 : f32 to vector<8x1xf32>
    %15 = arith.maximumf %13, %14 : vector<8x1xf32>
    %16 = tpu.reciprocal %15 : vector<8x1xf32> -> vector<8x1xf32>
    %17 = vector.broadcast %16 : vector<8x1xf32> to vector<8x64xf32>
    %18 = arith.mulf %11, %17 : vector<8x64xf32>
    %c0_2 = arith.constant 0 : index
    %c0_3 = arith.constant 0 : index
    %19 = vector.load %arg0[%c0_2, %c0_3] : memref<64x32xf32, #tpu.memory_space<vmem>>, vector<64x32xf32>
    %cst_4 = arith.constant dense<0.000000e+00> : vector<8x32xf32>
    %20 = tpu.matmul %18, %19, %cst_4 {dimension_numbers = #tpu.dot_dimension_numbers<[1], [0], [0], [1], [0, 0, 1, 1], [], []>} : vector<8x64xf32>, vector<64x32xf32>, vector<8x32xf32> -> vector<8x32xf32>
    %21 = tpu.iota {dimensions = array<i32: 1>} : vector<8x8xi32>
    %22 = vector.broadcast %3 : vector<8x1xi32> to vector<8x8xi32>
    %23 = arith.cmpi eq, %21, %22 : vector<8x8xi32>
    %24 = arith.extui %23 : vector<8x8xi1> to vector<8x8xi32>
    %25 = arith.sitofp %24 : vector<8x8xi32> to vector<8x8xf32>
    %c0_5 = arith.constant 0 : index
    %c0_6 = arith.constant 0 : index
    %26 = vector.load %arg3[%c0_5, %c0_6] : memref<232x32xf32, #tpu.memory_space<vmem>>, vector<32x32xf32>
    %cst_7 = arith.constant dense<0.000000e+00> : vector<8x32xf32>
    %27 = tpu.matmul %20, %26, %cst_7 {dimension_numbers = #tpu.dot_dimension_numbers<[1], [0], [0], [1], [0, 0, 1, 1], [], []>} : vector<8x32xf32>, vector<32x32xf32>, vector<8x32xf32> -> vector<8x32xf32>
    %c64 = arith.constant 64 : index
    %c0_8 = arith.constant 0 : index
    %28 = vector.load %arg3[%c64, %c0_8] : memref<232x32xf32, #tpu.memory_space<vmem>>, vector<8x32xf32>
    %cst_9 = arith.constant dense<0.000000e+00> : vector<8x32xf32>
    %29 = tpu.matmul %25, %28, %cst_9 {dimension_numbers = #tpu.dot_dimension_numbers<[1], [0], [0], [1], [0, 0, 1, 1], [], []>} : vector<8x8xf32>, vector<8x32xf32>, vector<8x32xf32> -> vector<8x32xf32>
    %30 = arith.addf %27, %29 : vector<8x32xf32>
    %c32 = arith.constant 32 : index
    %c0_10 = arith.constant 0 : index
    %31 = vector.load %arg3[%c32, %c0_10] : memref<232x32xf32, #tpu.memory_space<vmem>>, vector<32x32xf32>
    %cst_11 = arith.constant dense<0.000000e+00> : vector<8x32xf32>
    %32 = tpu.matmul %20, %31, %cst_11 {dimension_numbers = #tpu.dot_dimension_numbers<[1], [0], [0], [1], [0, 0, 1, 1], [], []>} : vector<8x32xf32>, vector<32x32xf32>, vector<8x32xf32> -> vector<8x32xf32>
    %c72 = arith.constant 72 : index
    %c0_12 = arith.constant 0 : index
    %33 = vector.load %arg3[%c72, %c0_12] : memref<232x32xf32, #tpu.memory_space<vmem>>, vector<8x32xf32>
    %cst_13 = arith.constant dense<0.000000e+00> : vector<8x32xf32>
    %34 = tpu.matmul %25, %33, %cst_13 {dimension_numbers = #tpu.dot_dimension_numbers<[1], [0], [0], [1], [0, 0, 1, 1], [], []>} : vector<8x8xf32>, vector<8x32xf32>, vector<8x32xf32> -> vector<8x32xf32>
    %35 = arith.addf %32, %34 : vector<8x32xf32>
    %c80 = arith.constant 80 : index
    %c0_14 = arith.constant 0 : index
    %36 = vector.load %arg3[%c80, %c0_14] : memref<232x32xf32, #tpu.memory_space<vmem>>, vector<152x32xf32>
    %c0_15 = arith.constant 0 : index
    %c0_16 = arith.constant 0 : index
    %37 = vector.load %arg6[%c0_15, %c0_16] : memref<152x32xf32, #tpu.memory_space<vmem>>, vector<152x32xf32>
    tpu.vector_store %arg6[%c0_15, %c0_16], %36 {strides = array<i32>} : memref<152x32xf32, #tpu.memory_space<vmem>>, vector<152x32xf32>,
    %c0_17 = arith.constant 0 : index
    %c0_18 = arith.constant 0 : index
    %38 = vector.load %arg6[%c0_17, %c0_18] : memref<152x32xf32, #tpu.memory_space<vmem>>, vector<8x32xf32>
    tpu.vector_store %arg6[%c0_17, %c0_18], %30 {strides = array<i32>} : memref<152x32xf32, #tpu.memory_space<vmem>>, vector<8x32xf32>,
    %c16 = arith.constant 16 : index
    %c0_19 = arith.constant 0 : index
    %39 = vector.load %arg6[%c16, %c0_19] : memref<152x32xf32, #tpu.memory_space<vmem>>, vector<8x32xf32>
    tpu.vector_store %arg6[%c16, %c0_19], %35 {strides = array<i32>} : memref<152x32xf32, #tpu.memory_space<vmem>>, vector<8x32xf32>,
    %c0_20 = arith.constant 0 : index
    %c0_21 = arith.constant 0 : index
    %40 = vector.load %arg2[%c0_20, %c0_21] : memref<16x8xi32, #tpu.memory_space<vmem>>, vector<16x8xi32>
    %41 = tpu.iota {dimensions = array<i32: 1>} : vector<16x152xi32>
    %42 = vector.extract_strided_slice %40 {offsets = [0, 0], sizes = [16, 1], strides = [1, 1]} : vector<16x8xi32> to vector<16x1xi32>
    %43 = vector.broadcast %42 : vector<16x1xi32> to vector<16x152xi32>
    %44 = arith.cmpi eq, %41, %43 : vector<16x152xi32>
    %45 = vector.extract_strided_slice %40 {offsets = [0, 1], sizes = [16, 1], strides = [1, 1]} : vector<16x8xi32> to vector<16x1xi32>
    %46 = vector.broadcast %45 : vector<16x1xi32> to vector<16x152xi32>
    %47 = arith.cmpi eq, %41, %46 : vector<16x152xi32>
    %48 = arith.ori %44, %47 : vector<16x152xi1>
    %49 = vector.extract_strided_slice %40 {offsets = [0, 2], sizes = [16, 1], strides = [1, 1]} : vector<16x8xi32> to vector<16x1xi32>
    %50 = vector.broadcast %49 : vector<16x1xi32> to vector<16x152xi32>
    %51 = arith.cmpi eq, %41, %50 : vector<16x152xi32>
    %52 = arith.ori %48, %51 : vector<16x152xi1>
    %53 = vector.extract_strided_slice %40 {offsets = [0, 3], sizes = [16, 1], strides = [1, 1]} : vector<16x8xi32> to vector<16x1xi32>
    %54 = vector.broadcast %53 : vector<16x1xi32> to vector<16x152xi32>
    %55 = arith.cmpi eq, %41, %54 : vector<16x152xi32>
    %56 = arith.ori %52, %55 : vector<16x152xi1>
    %57 = vector.extract_strided_slice %40 {offsets = [0, 4], sizes = [16, 1], strides = [1, 1]} : vector<16x8xi32> to vector<16x1xi32>
    %58 = vector.broadcast %57 : vector<16x1xi32> to vector<16x152xi32>
    %59 = arith.cmpi eq, %41, %58 : vector<16x152xi32>
    %60 = arith.ori %56, %59 : vector<16x152xi1>
    %61 = arith.extui %60 : vector<16x152xi1> to vector<16x152xi32>
    %62 = arith.sitofp %61 : vector<16x152xi32> to vector<16x152xf32>
    %c0_22 = arith.constant 0 : index
    %c0_23 = arith.constant 0 : index
    %63 = vector.load %arg6[%c0_22, %c0_23] : memref<152x32xf32, #tpu.memory_space<vmem>>, vector<152x32xf32>
    %cst_24 = arith.constant dense<0.000000e+00> : vector<16x32xf32>
    %64 = tpu.matmul %62, %63, %cst_24 {dimension_numbers = #tpu.dot_dimension_numbers<[1], [0], [0], [1], [0, 0, 1, 1], [], []>} : vector<16x152xf32>, vector<152x32xf32>, vector<16x32xf32> -> vector<16x32xf32>
    %cst_25 = arith.constant 0.000000e+00 : f32
    %65 = vector.broadcast %cst_25 : f32 to vector<16x32xf32>
    %66 = arith.maximumf %64, %65 : vector<16x32xf32>
    %c0_26 = arith.constant 0 : index
    %c0_27 = arith.constant 0 : index
    %67 = vector.load %arg4[%c0_26, %c0_27] : memref<40x128xf32, #tpu.memory_space<vmem>>, vector<40x128xf32>
    %68 = vector.extract_strided_slice %67 {offsets = [0, 0], sizes = [32, 128], strides = [1, 1]} : vector<40x128xf32> to vector<32x128xf32>
    %cst_28 = arith.constant dense<0.000000e+00> : vector<16x128xf32>
    %69 = tpu.matmul %66, %68, %cst_28 {dimension_numbers = #tpu.dot_dimension_numbers<[1], [0], [0], [1], [0, 0, 1, 1], [], []>} : vector<16x32xf32>, vector<32x128xf32>, vector<16x128xf32> -> vector<16x128xf32>
    %70 = vector.extract_strided_slice %67 {offsets = [32, 0], sizes = [1, 128], strides = [1, 1]} : vector<40x128xf32> to vector<1x128xf32>
    %71 = vector.broadcast %70 : vector<1x128xf32> to vector<16x128xf32>
    %72 = arith.addf %69, %71 : vector<16x128xf32>
    %c0_29 = arith.constant 0 : index
    %c0_30 = arith.constant 0 : index
    %73 = vector.load %arg5[%c0_29, %c0_30] : memref<16x128xf32, #tpu.memory_space<vmem>>, vector<16x128xf32>
    tpu.vector_store %arg5[%c0_29, %c0_30], %72 {strides = array<i32>} : memref<16x128xf32, #tpu.memory_space<vmem>>, vector<16x128xf32>,
    return
  }
}

</mosaic_0001>

<bundles_post_ra>
// kernel: _lambda_.1
= control target key start
LH: loop header
LB: loop body
LE: loop exit
PB: predicated region body
PF: predicated region fallthrough
CT: control target
= control target key end

     0   :  { %v933_v0 = vmov 0   ;;  %v934_v2 = vmov 1   ;;  %v935_v3 = vmov 0.0   ;;  %v936_v4 = vmov 0.0|0.0   ;;  %s1235_s1 = inlined_call_operand.vmem [shape: s32[8,8], index: 1, kind: input, shape index: {}]   ;;  %s1236_s0 = inlined_call_operand.vmem [shape: f32[64,32], index: 0, kind: input, shape index: {}]   ;;  %s1237_s2 = inlined_call_operand.vmem [shape: s32[16,8], index: 2, kind: input, shape index: {}]   ;;  %s1238_s3 = inlined_call_operand.vmem [shape: f32[232,32], index: 3, kind: input, shape index: {}]   ;;  %s1239_s4 = inlined_call_operand.vmem [shape: f32[40,128], index: 4, kind: input, shape index: {}]   ;;  %s1240_s5 = inlined_call_operand.vmem [shape: f32[16,128], index: 5, kind: output, shape index: {}]  }
   0x1   :  { %918 = vset.pattern.permute.xlu0 %v933_v0  ;;  %v20_v1 = vld [vmem:[%s1235_s1] sm:$0xff]  ;;  %805 = vmatprep.subr.mxu0 %v935_v3  ;;  %v21_v5 = vlaneseq  ;;  %vm34_vm2 = vcmask 523264   ;;  %v42_v12 = vld [vmem:[%s1236_s0 + $0x8] sm:$0xff]  ;;  %v43_v14 = vld [vmem:[%s1236_s0 + $0x10] sm:$0xff]  ;;  %vm937_vm4 = vmmov 0   ;;  %v938_v23 = vmov 2  }
   0x2   :  { %24 = vperm.xlu0 %918, %v20_v1   ;;  %848 = vmatprep.subr.bf16.mxu1 %v936_v4  ;;  %v41_v11 = vld [vmem:[%s1236_s0] sm:$0xff]  ;;  %v44_v15 = vld [vmem:[%s1236_s0 + $0x18] sm:$0xff]  ;;  %v46_v18 = vld [vmem:[%s1236_s0 + $0x28] sm:$0xff]  ;;  %v939_v26 = vmov 3   ;;  %v940_v27 = vmov 4   ;;  %vm133_vm10 = vcmask 64512  }
   0x3   :  { %v980_v7 = vand.u32 127, %v21_v5  ;;  %v849_v13 = vpack.c.bf16 %v42_v12, %v41_v11  ;;  %v852_v16 = vpack.c.bf16 %v44_v15, %v43_v14  ;;  %v45_v17 = vld [vmem:[%s1236_s0 + $0x20] sm:$0xff]  ;;  %802 = vmatprep.mubr.msk.f32.mxu1 %vm937_vm4, %v935_v3  ;;  %807 = vmatprep.mubr.msk.f32.mxu0 %vm937_vm4, %v935_v3  ;;  %v47_v20 = vld [vmem:[%s1236_s0 + $0x30] sm:$0xff]  ;;  %v48_v21 = vld [vmem:[%s1236_s0 + $0x38] sm:$0xff] }
   0x4   :  { %v855_v19 = vpack.c.bf16 %v46_v18, %v45_v17  ;;  %v858_v22 = vpack.c.bf16 %v48_v21, %v47_v20  ;;  %920 = vset.pattern.permute.xlu1 %v938_v23  ;;  %v466_v24 = vld [vmem:[%s1237_s2] sm:$0xff]  ;;  %v129_v31 = vld [vmem:[%s1238_s3 + $0x8] sm:$0xff]  ;;  %v130_v35 = vld [vmem:[%s1238_s3 + $0x10] sm:$0xff] }
   0x5   :  { %850 = vmatpush3.bf16.msra.mxu1 %v849_v13  ;;  %v132_v25 = vld [vmem:[%s1238_s3 + $0x40] sm:$0xff]  ;;  %v131_v36 = vld [vmem:[%s1238_s3 + $0x18] sm:$0xff]  ;;  %v1047_v40 = vadd.s32 128, %v980_v7  ;;  %v467_v47 = vld [vmem:[%s1237_s2 + $0x8] sm:$0xff] }
   0x6   :  { %919 = vset.pattern.permute.xlu0 %v934_v2  ;;  %851 = vmatprep.subr.bf16.mxu1 %v936_v4  ;;  %v128_v30 = vld [vmem:[%s1238_s3] sm:$0xff]  ;;  %v864_v37 = vpack.c.bf16 %v131_v36, %v130_v35  ;;  %v285_v48 = vld [vmem:[%s1238_s3 + $0x48] sm:$0xff]  ;;  %v283_v54 = vld [vmem:[%s1238_s3 + $0x30] sm:$0xff] }
   0x7   :  { %28 = vperm.xlu0 %919, %v20_v1   ;;  %806 = vmatpush3.msra.mxu0 %v132_v25  ;;  %v861_v33 = vpack.c.bf16 %v129_v31, %v128_v30  ;;  %v281_v49 = vld [vmem:[%s1238_s3 + $0x20] sm:$0xff]  ;;  %v282_v50 = vld [vmem:[%s1238_s3 + $0x28] sm:$0xff]  ;;  %v284_v55 = vld [vmem:[%s1238_s3 + $0x38] sm:$0xff] }
   0x8   :  { %872 = vmatprep.subr.bf16.mxu0 %v936_v4  ;;  %v867_v53 = vpack.c.bf16 %v282_v50, %v281_v49  ;;  %v870_v56 = vpack.c.bf16 %v284_v55, %v283_v54  ;;  %v426_v58 = vld [vmem:[%s1238_s3 + $0x50] sm:$0xff]  ;;  %v427_v60 = vld [vmem:[%s1238_s3 + $0x58] sm:$0xff]  ;;  %v428_v61 = vld [vmem:[%s1238_s3 + $0x60] sm:$0xff] }
   0x9   :  { %853 = vmatpush3.bf16.msra.mxu1 %v852_v16  ;;  %v429_v62 = vld [vmem:[%s1238_s3 + $0x68] sm:$0xff]  ;;  %v430_v63 = vld [vmem:[%s1238_s3 + $0x70] sm:$0xff]  ;;  %v439_v12 = vld [vmem:[%s1238_s3 + $0xb8] sm:$0xff] }
   0xa   :  { %854 = vmatprep.subr.bf16.mxu1 %v936_v4  ;;  %v438_v11 = vld [vmem:[%s1238_s3 + $0xb0] sm:$0xff]  ;;  %v440_v13 = vld [vmem:[%s1238_s3 + $0xc0] sm:$0xff]  ;;  %v441_v14 = vld [vmem:[%s1238_s3 + $0xc8] sm:$0xff] }
   0xb   :  { %921 = vset.pattern.permute.xlu0 %v933_v0  ;;  %v442_v15 = vld [vmem:[%s1238_s3 + $0xd0] sm:$0xff]  ;;  %v443_v16 = vld [vmem:[%s1238_s3 + $0xd8] sm:$0xff]  ;;  %v444_v17 = vld [vmem:[%s1238_s3 + $0xe0] sm:$0xff] }
   0xc   :  { %470 = vperm.xlu0 %921, %v466_v24   ;;  %v646_v18 = vld [vmem:[%s1239_s4] sm:$0xff] }
   0xd   :  { %856 = vmatpush3.bf16.msra.mxu1 %v855_v19  ;;  %v647_v19 = vld [vmem:[%s1239_s4 + $0x8] sm:$0xff] }
   0xe   :  { %857 = vmatprep.subr.bf16.mxu1 %v936_v4  ;;  %v899_v20 = vpack.c.bf16 %v647_v19, %v646_v18 }
  0x10   :  { %922 = vset.pattern.permute.xlu0 %v934_v2 }
  0x11   :  { %859 = vmatpush3.bf16.msra.mxu1 %v858_v22  ;;  %480 = vperm.xlu0 %922, %v466_v24  }
  0x12   :  { %860 = vmatprep.subr.bf16.mxu1 %v936_v4 }
  0x15   :  { %924 = vset.pattern.permute.xlu0 %v940_v27 }
  0x16   :  { %522 = vperm.xlu0 %924, %v466_v24  }
  0x1a   :  { %927 = vset.pattern.permute.xlu0 %v938_v23 }
  0x1b   :  { %497 = vperm.xlu0 %927, %v467_v47  }
  0x1f   :  { %930 = vset.pattern.permute.xlu0 %v940_v27 }
  0x81   :  { %v25_v6 = vpop.permute.xlu0 %24 }
  0x82   :  { %vm26_vm0 = vcmp.ge.s32.totalorder %v980_v7, %v25_v6  ;;  %v434_v6 = vld [vmem:[%s1238_s3 + $0x90] sm:$0xff] }
  0x86   :  { %v29_v8 = vpop.permute.xlu0 %28 }
  0x87   :  { %vm30_vm1 = vcmp.lt.s32.totalorder %v980_v7, %v29_v8  ;;  %v435_v8 = vld [vmem:[%s1238_s3 + $0x98] sm:$0xff] }
  0x88   :  { %vm31_vm3 = vmand %vm26_vm0, %vm30_vm1  ;;  %vm1242_vm0 = vcmask 195584   ;;  %vm1241_vm1 = vcmask 261120  }
  0x89   :  { %v742_v9 = vsel %vm31_vm3, 1.0, %v935_v3  ;;  %445 = vst.msk [vmem:[#allocation2] sm:$0xff] %vm1241_vm1, %v426_v58  ;;  %446 = vst.msk [vmem:[#allocation2 + $0x8] sm:$0xff] %vm1241_vm1, %v427_v60 }
  0x8a   :  { %v35_v10 = vsel %vm34_vm2, %v742_v9, 0.0  ;;  %447 = vst.msk [vmem:[#allocation2 + $0x10] sm:$0xff] %vm1241_vm1, %v428_v61  ;;  %448 = vst.msk [vmem:[#allocation2 + $0x18] sm:$0xff] %vm1241_vm1, %v429_v62  ;;  %v648_v61 = vld [vmem:[%s1239_s4 + $0x10] sm:$0xff] }
  0x8b   :  { %36 = vadd.xlane.f32.xlu1 %v35_v10  ;;  %v1044_v38 = vpop.permute.xlu0 %470  ;;  %449 = vst.msk [vmem:[#allocation2 + $0x20] sm:$0xff] %vm1241_vm1, %v430_v63  ;;  %453 = vst.msk [vmem:[#allocation2 + $0x40] sm:$0xff] %vm1241_vm1, %v434_v6  ;;  %v437_v10 = vld [vmem:[%s1238_s3 + $0xa8] sm:$0xff] }
  0x8c   :  { %vm476_vm6 = vcmp.eq.s32.totalorder %v1047_v40, %v1044_v38  ;;  %454 = vst.msk [vmem:[#allocation2 + $0x48] sm:$0xff] %vm1241_vm1, %v435_v8  ;;  %456 = vst.msk [vmem:[#allocation2 + $0x58] sm:$0xff] %vm1241_vm1, %v437_v10  ;;  %v652_v8 = vshrl.u32 %v21_v5, 7  ;;  %v650_v10 = vld [vmem:[%s1239_s4 + $0x20] sm:$0xff] }
  0x8d   :  { %457 = vst.msk [vmem:[#allocation2 + $0x60] sm:$0xff] %vm1241_vm1, %v438_v11  ;;  %458 = vst.msk [vmem:[#allocation2 + $0x68] sm:$0xff] %vm1241_vm1, %v439_v12 }
  0x8e   :  { %459 = vst.msk [vmem:[#allocation2 + $0x70] sm:$0xff] %vm1241_vm1, %v440_v13  ;;  %460 = vst.msk [vmem:[#allocation2 + $0x78] sm:$0xff] %vm1241_vm1, %v441_v14 }
  0x8f   :  { %461 = vst.msk [vmem:[#allocation2 + $0x80] sm:$0xff] %vm1241_vm1, %v442_v15  ;;  %462 = vst.msk [vmem:[#allocation2 + $0x88] sm:$0xff] %vm1241_vm1, %v443_v16 }
  0x90   :  { %v1049_v41 = vpop.permute.xlu0 %480  ;;  %463 = vst.msk [vmem:[#allocation2 + $0x90] sm:$0xff] %vm1241_vm1, %v444_v17 }
  0x91   :  { %vm486_vm7 = vcmp.eq.s32.totalorder %v1047_v40, %v1049_v41  ;;  %vm485_vm3 = vcmp.eq.s32.totalorder %v980_v7, %v1049_v41 }
  0x92   :  { %vm490_vm9 = vmor %vm476_vm6, %vm486_vm7  ;;  %v547_v31 = vld [vmem:[#allocation2 + $0x20] sm:$0xff] }
  0x93   :  { %v554_v49 = vld [vmem:[#allocation2 + $0x58] sm:$0xff] }
  0x95   :  { %v1064_v45 = vpop.permute.xlu0 %522  ;;  %v557_v55 = vld [vmem:[#allocation2 + $0x70] sm:$0xff] }
  0x96   :  { %vm528_vm13 = vcmp.eq.s32.totalorder %v1047_v40, %v1064_v45  ;;  %v559_v41 = vld [vmem:[#allocation2 + $0x80] sm:$0xff] }
  0x9a   :  { %v498_v58 = vpop.permute.xlu0 %497 }
  0x9c   :  { %123 = vperm.xlu1 %920, %v20_v1   ;;  %v432_v1 = vld [vmem:[%s1238_s3 + $0x80] sm:$0xff] }
  0x9d   :  { %451 = vst.msk [vmem:[#allocation2 + $0x30] sm:$0xff] %vm1241_vm1, %v432_v1 }
  0xa0   :  { %494 = vperm.xlu1 %920, %v466_v24  }
  0xa4   :  { %923 = vset.pattern.permute.xlu1 %v939_v26  ;;  %v549_v35 = vld [vmem:[#allocation2 + $0x30] sm:$0xff] }
  0xa5   :  { %508 = vperm.xlu1 %923, %v466_v24   ;;  %v544_v24 = vld [vmem:[#allocation2 + $0x8] sm:$0xff] }
  0xa9   :  { %925 = vset.pattern.permute.xlu1 %v933_v0  ;;  %v431_v0 = vld [vmem:[%s1238_s3 + $0x78] sm:$0xff] }
  0xaa   :  { %473 = vperm.xlu1 %925, %v467_v47   ;;  %450 = vst.msk [vmem:[#allocation2 + $0x28] sm:$0xff] %vm1241_vm1, %v431_v0 }
  0xae   :  { %926 = vset.pattern.permute.xlu1 %v934_v2  ;;  %v433_v2 = vld [vmem:[%s1238_s3 + $0x88] sm:$0xff] }
  0xaf   :  { %483 = vperm.xlu1 %926, %v467_v47   ;;  %452 = vst.msk [vmem:[#allocation2 + $0x38] sm:$0xff] %vm1241_vm1, %v433_v2 }
  0xb3   :  { %928 = vset.pattern.permute.xlu1 %v939_v26 }
  0xb4   :  { %511 = vperm.xlu1 %928, %v467_v47  }
  0xb6   :  { %v550_v36 = vld [vmem:[#allocation2 + $0x38] sm:$0xff] }
  0xb8   :  { %929 = vset.pattern.permute.xlu1 %v940_v27 }
  0xb9   :  { %525 = vperm.xlu1 %929, %v467_v47  }
 0x118   :  { %v37_v28 = vpop.xlane.xlu1 %36 }
 0x119   :  { %v38_v29 = vmax.f32 %v37_v28, 1.0 }
 0x11b   :  { %931 = vrcp.f32 %v38_v29  ;;  %v546_v29 = vld [vmem:[#allocation2 + $0x18] sm:$0xff] }
 0x11c   :  { %v124_v39 = vpop.permute.xlu1 %123 }
 0x11d   :  { %vm125_vm5 = vcmp.eq.s32.totalorder %v980_v7, %v124_v39  ;;  %v551_v39 = vld [vmem:[#allocation2 + $0x40] sm:$0xff] }
 0x11e   :  { %v744_v43 = vsel %vm125_vm5, 1.0, %v935_v3 }
 0x11f   :  { %808 = vmatmul.mubr.msk.f32.vlgmr.msra.gmra.mrb[0].mxu0 %vm133_vm10, %v744_v43 }
 0x120   :  { %v1052_v42 = vpop.permute.xlu1 %494 }
 0x121   :  { %vm500_vm8 = vcmp.eq.s32.totalorder %v1047_v40, %v1052_v42  ;;  %vm499_vm6 = vcmp.eq.s32.totalorder %v980_v7, %v1052_v42 }
 0x122   :  { %vm504_vm11 = vmor %vm490_vm9, %vm500_vm8 }
 0x124   :  { %v1062_v44 = vpop.permute.xlu1 %508 }
 0x125   :  { %v932_v32 = vpop.eup %931  ;;  %vm514_vm12 = vcmp.eq.s32.totalorder %v1047_v40, %v1062_v44 }
 0x126   :  { %v40_v34 = vmul.f32 %v932_v32, %v742_v9  ;;  %vm518_vm14 = vmor %vm504_vm11, %vm514_vm12  ;;  %v436_v9 = vld [vmem:[%s1238_s3 + $0xa0] sm:$0xff]  ;;  %v548_v32 = vld [vmem:[#allocation2 + $0x28] sm:$0xff]  ;;  %vm502_vm11 = vcmp.eq.s32.totalorder %v1047_v40, %v498_v58 }
 0x127   :  { %vm532_vm15 = vmor %vm518_vm14, %vm528_vm13  ;;  %455 = vst.msk [vmem:[#allocation2 + $0x50] sm:$0xff] %vm1241_vm1, %v436_v9  ;;  %vm513_vm13 = vcmp.eq.s32.totalorder %v980_v7, %v1062_v44  ;;  %v561_v44 = vld [vmem:[#allocation2 + $0x90] sm:$0xff]  ;;  %v653_v9 = vsub.s32 0, %v652_v8 }
 0x128   :  { %803 = vmatmul.mubr.msk.f32.vlgmr.msra.gmra.mrb[0].mxu1 %vm34_vm2, %v40_v34  ;;  %v750_v46 = vsel %vm532_vm15, 1.0, %v935_v3  ;;  %v879_v34 = vpack.c.bf16 %v548_v32, %v547_v31  ;;  %vm475_vm2 = vcmp.eq.s32.totalorder %v980_v7, %v1044_v38  ;;  %vm501_vm15 = vcmp.eq.s32.totalorder %v980_v7, %v498_v58 }
 0x129   :  { %862 = vmatpush3.bf16.msra.mxu1 %v861_v33  ;;  %818 = vmatprep.mubr.msk.f32.mxu1 %vm937_vm4, %v935_v3  ;;  %vm489_vm7 = vmor %vm475_vm2, %vm485_vm3  ;;  %v654_v11 = vrot.slane %v650_v10, %v653_v9 }
 0x12a   :  { %863 = vmatprep.subr.bf16.mxu1 %v936_v4  ;;  %753 = vmatprep.mubr.msk.f32.mxu0 %vm1242_vm0, %v750_v46  ;;  %v474_v46 = vpop.permute.xlu1 %473  ;;  %vm503_vm12 = vmor %vm489_vm7, %vm499_vm6 }
 0x12b   :  { %vm477_vm8 = vcmp.eq.s32.totalorder %v980_v7, %v474_v46 }
 0x12d   :  { %865 = vmatpush3.bf16.msra.mxu1 %v864_v37  ;;  %v882_v37 = vpack.c.bf16 %v550_v36, %v549_v35 }
 0x12e   :  { %821 = vmatprep.subr.mxu1 %v935_v3  ;;  %v484_v50 = vpop.permute.xlu1 %483 }
 0x12f   :  { %vm488_vm5 = vcmp.eq.s32.totalorder %v1047_v40, %v484_v50  ;;  %vm487_vm9 = vcmp.eq.s32.totalorder %v980_v7, %v484_v50 }
 0x130   :  { %vm491_vm14 = vmor %vm477_vm8, %vm487_vm9 }
 0x131   :  { %vm505_vm7 = vmor %vm491_vm14, %vm501_vm15 }
 0x1f2   :  { %v203_v57 = vpop.f32.mrb[0].mxu0 }
 0x1f3   :  { %v809_v59 = vpop.f32.mrb[1].mxu0 }
 0x1f4   :  { %v560_v59 = vld [vmem:[#allocation2 + $0x88] sm:$0xff] }
 0x1f5   :  { %v897_v60 = vpack.c.bf16 %v560_v59, %v559_v41 }
 0x1fb   :  { %v118_v51 = vpop.f32.mrb[0].mxu1 }
 0x1fc   :  { %v804_v52 = vpop.f32.mrb[1].mxu1  ;;  %819 = vmatmul.mubr.msk.f32.vlgmr.msra.gmra.mrb[2].mxu1 %vm1241_vm1, %v118_v51 }
 0x1fd   :  { %822 = vmatpush3.msra.mxu1 %v285_v48  ;;  %823 = vmatprep.mubr.msk.f32.mxu1 %vm937_vm4, %v935_v3  ;;  %v553_v48 = vld [vmem:[#allocation2 + $0x50] sm:$0xff]  ;;  %v555_v52 = vld [vmem:[#allocation2 + $0x60] sm:$0xff] }
 0x1fe   :  { %866 = vmatprep.subr.bf16.mxu1 %v936_v4 }
 0x200   :  { %824 = vmatmul.mubr.msk.f32.vlgmr.msra.gmra.mrb[4].mxu1 %vm133_vm10, %v744_v43  ;;  %v552_v43 = vld [vmem:[#allocation2 + $0x48] sm:$0xff] }
 0x201   :  { %868 = vmatpush3.bf16.msra.mxu1 %v867_v53  ;;  %834 = vmatprep.mubr.msk.f32.mxu1 %vm937_vm4, %v935_v3  ;;  %v885_v47 = vpack.c.bf16 %v552_v43, %v551_v39  ;;  %v556_v53 = vld [vmem:[#allocation2 + $0x68] sm:$0xff]  ;;  %vm478_vm4 = vcmp.eq.s32.totalorder %v1047_v40, %v474_v46 }
 0x202   :  { %869 = vmatprep.subr.bf16.mxu1 %v936_v4  ;;  %v891_v54 = vpack.c.bf16 %v556_v53, %v555_v52  ;;  %vm492_vm10 = vmor %vm478_vm4, %vm488_vm5  ;;  %vm527_vm5 = vcmp.eq.s32.totalorder %v980_v7, %v1064_v45 }
 0x203   :  { %vm506_vm3 = vmor %vm492_vm10, %vm502_vm11 }
 0x204   :  { %vm517_vm4 = vmor %vm503_vm12, %vm513_vm13  ;;  %vm1243_vm13 = vcmask 195584  }
 0x205   :  { %871 = vmatpush3.bf16.msra.mxu1 %v870_v56  ;;  %v558_v56 = vld [vmem:[#allocation2 + $0x78] sm:$0xff]  ;;  %vm531_vm9 = vmor %vm517_vm4, %vm527_vm5 }
 0x206   :  { %900 = vmatprep.subr.bf16.mxu1 %v899_v20  ;;  %v894_v38 = vpack.c.bf16 %v558_v56, %v557_v55  ;;  %v749_v45 = vsel %vm531_vm9, 1.0, %v935_v3 }
 0x208   :  { %835 = vmatmul.mubr.msk.f32.vlgmr.msra.gmra.mrb[4].mxu1 %vm1241_vm1, %v118_v51  ;;  %v888_v51 = vpack.c.bf16 %v554_v49, %v553_v48 }
 0x209   :  { %902 = vmatpush3.bf16.msra.mxu1 %v899_v20 }
 0x2cf   :  { %v277_v21 = vpop.f32.mrb[2].mxu1 }
 0x2d0   :  { %v278_v22 = vadd.f32 %v277_v21, %v203_v57  ;;  %v820_v23 = vpop.f32.mrb[3].mxu1  ;;  %v512_v57 = vpop.permute.xlu1 %511 }
 0x2d1   :  { %vm516_vm2 = vcmp.eq.s32.totalorder %v1047_v40, %v512_v57  ;;  %vm515_vm6 = vcmp.eq.s32.totalorder %v980_v7, %v512_v57 }
 0x2d2   :  { %464 = vst.msk [vmem:[#allocation2] sm:$0xff] %vm1241_vm1, %v278_v22  ;;  %vm519_vm0 = vmor %vm505_vm7, %vm515_vm6 }
 0x2d4   :  { %v526_v42 = vpop.permute.xlu1 %525 }
 0x2d5   :  { %vm530_vm8 = vcmp.eq.s32.totalorder %v1047_v40, %v526_v42  ;;  %vm529_vm10 = vcmp.eq.s32.totalorder %v980_v7, %v526_v42  ;;  %v649_v7 = vld [vmem:[%s1239_s4 + $0x18] sm:$0xff] }
 0x2d6   :  { %vm533_vm12 = vmor %vm519_vm0, %vm529_vm10  ;;  %v903_v62 = vpack.c.bf16 %v649_v7, %v648_v61  ;;  %vm1244_vm0 = vcmask 261120  }
 0x2d7   :  { %v751_v40 = vsel %vm533_vm12, 1.0, %v935_v3 }
 0x2d8   :  { %904 = vmatprep.subr.bf16.mxu1 %v903_v62 }
 0x2d9   :  { %v543_v25 = vld [vmem:[#allocation2] sm:$0xff]  ;;  %906 = vmatpush3.bf16.msra.mxu1 %v903_v62 }
 0x2da   :  { %v873_v26 = vpack.c.bf16 %v544_v24, %v543_v25 }
 0x2db   :  { %v422_v27 = vpop.f32.mrb[4].mxu1 }
 0x2dc   :  { %465 = vst.msk [vmem:[#allocation2 + $0x10] sm:$0xff] %vm1241_vm1, %v422_v27  ;;  %v836_v28 = vpop.f32.mrb[5].mxu1  ;;  %874 = vmatpush1.bf16.msra.mxu0 %v873_v26  ;;  %vm520_vm1 = vmor %vm506_vm3, %vm516_vm2 }
 0x2dd   :  { %875 = vmatprep.subr.bf16.mxu0 %v936_v4  ;;  %vm534_vm11 = vmor %vm520_vm1, %vm530_vm8 }
 0x2de   :  { %vm1245_vm1 = vmmov %vm1244_vm0 }
 0x2e3   :  { %v545_v30 = vld [vmem:[#allocation2 + $0x10] sm:$0xff] }
 0x2e4   :  { %v876_v33 = vpack.c.bf16 %v546_v29, %v545_v30 }
 0x2e6   :  { %877 = vmatpush1.bf16.msra.mxu0 %v876_v33 }
 0x2e7   :  { %878 = vmatprep.subr.bf16.mxu0 %v936_v4 }
 0x2ea   :  { %880 = vmatpush1.bf16.msra.mxu0 %v879_v34 }
 0x2eb   :  { %881 = vmatprep.subr.bf16.mxu0 %v936_v4 }
 0x2ee   :  { %883 = vmatpush1.bf16.msra.mxu0 %v882_v37 }
 0x2ef   :  { %884 = vmatprep.subr.bf16.mxu0 %v936_v4 }
 0x2f2   :  { %886 = vmatpush1.bf16.msra.mxu0 %v885_v47 }
 0x2f3   :  { %887 = vmatprep.subr.bf16.mxu0 %v936_v4 }
 0x2f6   :  { %889 = vmatpush1.bf16.msra.mxu0 %v888_v51 }
 0x2f7   :  { %890 = vmatprep.subr.bf16.mxu0 %v936_v4 }
 0x2fa   :  { %892 = vmatpush1.bf16.msra.mxu0 %v891_v54 }
 0x2fb   :  { %893 = vmatprep.subr.bf16.mxu0 %v936_v4 }
 0x2fe   :  { %895 = vmatpush1.bf16.msra.mxu0 %v894_v38 }
 0x2ff   :  { %896 = vmatprep.subr.bf16.mxu0 %v936_v4  ;;  %v752_v4 = vsel %vm534_vm11, 1.0, %v935_v3 }
 0x302   :  { %898 = vmatpush1.bf16.msra.mxu0 %v897_v60 }
 0x303   :  { %605 = vmatprep.subr.mxu0 %v935_v3 }
 0x306   :  { %606 = vmatpush1.msra.mxu0 %v561_v44 }
 0x307   :  { %634 = vmatmul.mubr.f32.vlgmr.msra.gmra.mrb[2].mxu0 %v749_v45 }
 0x308   :  { %754 = vmatprep.mubr.msk.f32.mxu0 %vm1243_vm13, %v752_v4 }
 0x30b   :  { %639 = vmatmul.mubr.f32.gmra.mrb[4].mxu0 %v751_v40 }
 0x3da   :  { %v635_v63 = vpop.f32.mrb[2].mxu0 }
 0x3db   :  { %v644_v0 = vmax.f32 %v635_v63, 0.0  ;;  %v637_v1 = vpop.f32.mrb[3].mxu0 }
 0x3dd   :  { %845 = vmatprep.mubr.msk.f32.mxu1 %vm1244_vm0, %v644_v0 }
 0x3de   :  { %v640_v2 = vpop.f32.mrb[4].mxu0 }
 0x3df   :  { %v645_v6 = vmax.f32 %v640_v2, 0.0  ;;  %v642_v3 = vpop.f32.mrb[5].mxu0 }
 0x3e1   :  { %846 = vmatmul.mubr.msk.f32.vlgmr.msra.gmra.mrb[6].mxu1 %vm1245_vm1, %v645_v6 }
 0x4b4   :  { %v847_v12 = vpop.f32.mrb[6].mxu1 }
 0x4b5   :  { %v733_v13 = vadd.f32 %v847_v12, %v654_v11  ;;  %v727_v14 = vpop.f32.mrb[7].mxu1 }
 0x4b6   :  { %v728_v15 = vadd.f32 %v727_v14, %v654_v11 }
 0x4b7   :  { %737 = vst [vmem:[%s1240_s5 + $0x8] sm:$0xff] %v733_v13 }
 0x4b8   :  { %736 = vst [vmem:[%s1240_s5] sm:$0xff] %v728_v15 }

</bundles_post_ra>
